<compile_context>
chip_gen: v7x
topology: tpu7x:2x2x1
jax: 0.10.0
libtpu: 0.0.40
codegen_flags: <defaults>
</compile_context>

<pallas_src>
import jax
import jax.numpy as jnp
from jax.experimental import pallas as pl
from jax.experimental.pallas import tpu as pltpu


# ----------------------------- fused Pallas kernel -------------------------

def _make_fused_kernel(n_layers, window):
    """Builds the fused forward kernel for a given layer count / window size."""

    def kernel(x_ref, *refs):
        # refs = (w0, b0, ..., w_{L-1}, b_{L-1}, w_out2d, b_out, o_ref)
        o_ref = refs[-1]
        prm = refs[:-1]

        ws = [prm[2 * i][...] for i in range(n_layers)]
        bs = [prm[2 * i + 1][...] for i in range(n_layers)]
        w_out = prm[2 * n_layers][...]         # (window, C_last)
        b_out = prm[2 * n_layers + 1][...]     # (1, 1)

        tb, w, d = x_ref.shape

        # One contiguous (tb, W, D) slab folded into the matmul M dimension.
        # Layout-free merge when W % 8 == 0 (W = 8 here).
        h = x_ref[...].reshape(tb * window, d)              # (tb*W, D)

        # One MXU matmul per layer over all tb*W rows (window batched into M).
        for i in range(n_layers):
            y = jnp.dot(h, ws[i], preferred_element_type=jnp.float32) + bs[i]
            h = jnp.maximum(y, 0.01 * y)       # LeakyReLU(0.01); eval-mode Dropout = id

        c_last = w_out.shape[1]
        # Split the batch/window structure back out (layout-free for W % 8 == 0),
        # weight by w_out once (broadcast over the leading batch dim), and reduce.
        h3 = h.reshape(tb, window, c_last)                  # (tb, W, C_last)
        contrib = h3 * w_out                                 # VPU broadcast multiply
        p = jnp.sum(contrib, axis=2)                         # lane reduce -> (tb, W)
        logits = jnp.sum(p, axis=1, keepdims=True) + b_out   # lane reduce -> (tb, 1)
        o_ref[...] = jax.nn.sigmoid(logits)

    return kernel


# --------------------------- tiling / padding policy -----------------------

def _round_up(n, m):
    return ((n + m - 1) // m) * m


_MAX_TILE = 512  # batch rows per tile; per-tile footprint is only ~100s of KiB


def _choose_tile(b):
    """Returns (tile_rows, padded_batch).  Tiles are multiples of 8; batches that
    don't divide are zero-padded wrapper-side instead of collapsing to one giant
    unaligned tile.  When possible the batch is split into >=2 tiles so the
    'parallel' grid axis can shard across v7x's two TensorCores."""
    b_pad = _round_up(b, 8)
    if b_pad <= 2 * _MAX_TILE:
        if b_pad >= 64 and b_pad % 16 == 0:
            return b_pad // 2, b_pad          # two tiles -> megacore-friendly
        return b_pad, b_pad                   # single tile == full padded batch
    tb = _MAX_TILE
    return tb, _round_up(b_pad, tb)


# ------------------------------ model wrapper ------------------------------

def init_params(key, input_dim, n_layers, disc_hidden, window_size):
    """Deterministic synthetic parameters matching the module's shapes."""
    inputs = [input_dim] + [int(disc_hidden / 2 ** i) for i in range(n_layers - 1)]
    outputs = [int(disc_hidden / 2 ** i) for i in range(n_layers)]

    params = {"fcs": [], "out": None}
    for i in range(n_layers):
        key, kw, kb = jax.random.split(key, 3)
        scale = 1.0 / jnp.sqrt(jnp.float32(inputs[i]))
        w = jax.random.uniform(kw, (inputs[i], outputs[i]), jnp.float32, -scale, scale)
        b = jax.random.uniform(kb, (1, outputs[i]), jnp.float32, -scale, scale)
        params["fcs"].append((w, b))

    flat_dim = window_size * outputs[-1]
    key, kw, kb = jax.random.split(key, 3)
    scale = 1.0 / jnp.sqrt(jnp.float32(flat_dim))
    w_out = jax.random.uniform(kw, (flat_dim, 1), jnp.float32, -scale, scale)
    b_out = jax.random.uniform(kb, (1, 1), jnp.float32, -scale, scale)
    params["out"] = (w_out, b_out)
    return params


def simple_discriminator_tcn(params, x):
    """x: (B, window_size, input_dim)  ->  (B, 1)."""
    B, W, D = x.shape
    n_layers = len(params["fcs"])
    w_out, b_out = params["out"]
    c_last = params["fcs"][-1][0].shape[1]

    tb, b_pad = _choose_tile(B)

    # Natural (B, W, D) layout kept: each grid tile is one contiguous HBM read.
    x_p = x.astype(jnp.float32)
    if b_pad != B:
        x_p = jnp.pad(x_p, ((0, b_pad - B), (0, 0), (0, 0)))

    # w_out reshaped (W, C_last) matches PyTorch's flatten(start_dim=1) ordering.
    w_out2d = w_out.reshape(W, c_last).astype(jnp.float32)

    grid = (b_pad // tb,)

    flat_inputs = [x_p]
    in_specs = [pl.BlockSpec((tb, W, D), lambda i: (i, 0, 0))]
    for (w, b) in params["fcs"]:
        flat_inputs += [w, b]
        in_specs += [pl.BlockSpec(w.shape, lambda i: (0, 0)),    # VMEM-resident
                     pl.BlockSpec(b.shape, lambda i: (0, 0))]
    flat_inputs += [w_out2d, b_out]
    in_specs += [pl.BlockSpec(w_out2d.shape, lambda i: (0, 0)),
                 pl.BlockSpec(b_out.shape, lambda i: (0, 0))]

    out = pl.pallas_call(
        _make_fused_kernel(n_layers, W),
        out_shape=jax.ShapeDtypeStruct((b_pad, 1), jnp.float32),
        grid=grid,
        in_specs=in_specs,
        out_specs=pl.BlockSpec((tb, 1), lambda i: (i, 0)),
        compiler_params=pltpu.CompilerParams(
            dimension_semantics=("parallel",)),
    )(*flat_inputs)

    return out[:B]


def _reference(params, x):
    """Pure-JAX reference for correctness check."""
    B, W, D = x.shape
    h = x.reshape(B * W, D).astype(jnp.float32)
    for (w, b) in params["fcs"]:
        y = h @ w + b
        h = jnp.where(y > 0, y, 0.01 * y)
    h = h.reshape(B, -1)
    w_out, b_out = params["out"]
    return jax.nn.sigmoid(h @ w_out + b_out)


# ---------------------------------- main -----------------------------------

if __name__ == "__main__":
    # Small shapes consistent with the module's constructor:
    #   input_dim=4, n_layers=2, disc_hidden=32, window_size=8, batch=2
    B, W, D = 2, 8, 4
    N_LAYERS, DISC_HIDDEN = 2, 32

    key = jax.random.PRNGKey(0)
    key, kx = jax.random.split(key)
    x = jax.random.normal(kx, (B, W, D), dtype=jnp.float32)

    params = init_params(key, input_dim=D, n_layers=N_LAYERS,
                         disc_hidden=DISC_HIDDEN, window_size=W)

    out = simple_discriminator_tcn(params, x)
    out = jax.block_until_ready(out)

    ref = _reference(params, x)
    assert out.shape == (B, 1), out.shape
    assert jnp.allclose(out, ref, atol=1e-5, rtol=1e-5), (out, ref)

    print("KERNEL_OK")
</pallas_src>

<mosaic_0001>
module attributes {stable_mosaic.version = 11 : i64} {
  func.func @kernel(%arg0: i32, %arg1: memref<8x8x4xf32, #tpu.memory_space<vmem>>, %arg2: memref<4x32xf32, #tpu.memory_space<vmem>>, %arg3: memref<1x32xf32, #tpu.memory_space<vmem>>, %arg4: memref<32x16xf32, #tpu.memory_space<vmem>>, %arg5: memref<1x16xf32, #tpu.memory_space<vmem>>, %arg6: memref<8x16xf32, #tpu.memory_space<vmem>>, %arg7: memref<1x1xf32, #tpu.memory_space<vmem>>, %arg8: memref<8x1xf32, #tpu.memory_space<vmem>>) attributes {dimension_semantics = [#tpu.dimension_semantics<parallel>], iteration_bounds = array<i64: 1>, scalar_prefetch = 0 : i64, scratch_operands = 0 : i64, tpu.core_type = #tpu.core_type<tc>, window_params = [{transform_indices = @transform_0, window_bounds = array<i64: 8, 8, 4>}, {pipeline_mode = #tpu.pipeline_mode<synchronous>, transform_indices = @transform_1, window_bounds = array<i64: 4, 32>}, {pipeline_mode = #tpu.pipeline_mode<synchronous>, transform_indices = @transform_2, window_bounds = array<i64: 1, 32>}, {pipeline_mode = #tpu.pipeline_mode<synchronous>, transform_indices = @transform_3, window_bounds = array<i64: 32, 16>}, {pipeline_mode = #tpu.pipeline_mode<synchronous>, transform_indices = @transform_4, window_bounds = array<i64: 1, 16>}, {pipeline_mode = #tpu.pipeline_mode<synchronous>, transform_indices = @transform_5, window_bounds = array<i64: 8, 16>}, {pipeline_mode = #tpu.pipeline_mode<synchronous>, transform_indices = @transform_6, window_bounds = array<i64: 1, 1>}, {transform_indices = @transform_7, window_bounds = array<i64: 8, 1>}]} {
    %c0 = arith.constant 0 : index
    %c0_0 = arith.constant 0 : index
    %0 = vector.load %arg2[%c0, %c0_0] : memref<4x32xf32, #tpu.memory_space<vmem>>, vector<4x32xf32>
    %c0_1 = arith.constant 0 : index
    %c0_2 = arith.constant 0 : index
    %1 = vector.load %arg4[%c0_1, %c0_2] : memref<32x16xf32, #tpu.memory_space<vmem>>, vector<32x16xf32>
    %c0_3 = arith.constant 0 : index
    %c0_4 = arith.constant 0 : index
    %2 = vector.load %arg3[%c0_3, %c0_4] : memref<1x32xf32, #tpu.memory_space<vmem>>, vector<1x32xf32>
    %c0_5 = arith.constant 0 : index
    %c0_6 = arith.constant 0 : index
    %3 = vector.load %arg5[%c0_5, %c0_6] : memref<1x16xf32, #tpu.memory_space<vmem>>, vector<1x16xf32>
    %c0_7 = arith.constant 0 : index
    %c0_8 = arith.constant 0 : index
    %4 = vector.load %arg6[%c0_7, %c0_8] : memref<8x16xf32, #tpu.memory_space<vmem>>, vector<8x16xf32>
    %c0_9 = arith.constant 0 : index
    %c0_10 = arith.constant 0 : index
    %5 = vector.load %arg7[%c0_9, %c0_10] : memref<1x1xf32, #tpu.memory_space<vmem>>, vector<1x1xf32>
    %c0_11 = arith.constant 0 : index
    %c0_12 = arith.constant 0 : index
    %c0_13 = arith.constant 0 : index
    %6 = vector.load %arg1[%c0_11, %c0_12, %c0_13] : memref<8x8x4xf32, #tpu.memory_space<vmem>>, vector<8x8x4xf32>
    %7 = vector.shape_cast %6 : vector<8x8x4xf32> to vector<64x4xf32>
    %cst = arith.constant dense<0.000000e+00> : vector<64x32xf32>
    %8 = tpu.matmul %7, %0, %cst {dimension_numbers = #tpu.dot_dimension_numbers<[1], [0], [0], [1], [0, 0, 1, 1], [], []>} : vector<64x4xf32>, vector<4x32xf32>, vector<64x32xf32> -> vector<64x32xf32>
    %9 = vector.broadcast %2 : vector<1x32xf32> to vector<64x32xf32>
    %10 = arith.addf %8, %9 : vector<64x32xf32>
    %cst_14 = arith.constant 0.00999999977 : f32
    %11 = vector.broadcast %cst_14 : f32 to vector<64x32xf32>
    %12 = arith.mulf %11, %10 : vector<64x32xf32>
    %13 = arith.maximumf %10, %12 : vector<64x32xf32>
    %cst_15 = arith.constant dense<0.000000e+00> : vector<64x16xf32>
    %14 = tpu.matmul %13, %1, %cst_15 {dimension_numbers = #tpu.dot_dimension_numbers<[1], [0], [0], [1], [0, 0, 1, 1], [], []>} : vector<64x32xf32>, vector<32x16xf32>, vector<64x16xf32> -> vector<64x16xf32>
    %15 = vector.broadcast %3 : vector<1x16xf32> to vector<64x16xf32>
    %16 = arith.addf %14, %15 : vector<64x16xf32>
    %cst_16 = arith.constant 0.00999999977 : f32
    %17 = vector.broadcast %cst_16 : f32 to vector<64x16xf32>
    %18 = arith.mulf %17, %16 : vector<64x16xf32>
    %19 = arith.maximumf %16, %18 : vector<64x16xf32>
    %20 = vector.shape_cast %19 : vector<64x16xf32> to vector<8x8x16xf32>
    %21 = vector.shape_cast %4 : vector<8x16xf32> to vector<1x8x16xf32>
    %22 = vector.broadcast %21 : vector<1x8x16xf32> to vector<8x8x16xf32>
    %23 = arith.mulf %20, %22 : vector<8x8x16xf32>
    %cst_17 = arith.constant dense<0.000000e+00> : vector<8x8xf32>
    %24 = vector.multi_reduction <add>, %23, %cst_17 [2] : vector<8x8x16xf32> to vector<8x8xf32>
    %cst_18 = arith.constant dense<0.000000e+00> : vector<8xf32>
    %25 = vector.multi_reduction <add>, %24, %cst_18 [1] : vector<8x8xf32> to vector<8xf32>
    %26 = vector.shape_cast %25 : vector<8xf32> to vector<8x1xf32>
    %27 = vector.broadcast %5 : vector<1x1xf32> to vector<8x1xf32>
    %28 = arith.addf %26, %27 : vector<8x1xf32>
    %29 = arith.negf %28 : vector<8x1xf32>
    %30 = math.exp %29 : vector<8x1xf32>
    %cst_19 = arith.constant 1.000000e+00 : f32
    %31 = vector.broadcast %cst_19 : f32 to vector<8x1xf32>
    %32 = arith.addf %31, %30 : vector<8x1xf32>
    %33 = arith.divf %31, %32 : vector<8x1xf32>
    %c0_20 = arith.constant 0 : index
    %c0_21 = arith.constant 0 : index
    %34 = vector.load %arg8[%c0_20, %c0_21] : memref<8x1xf32, #tpu.memory_space<vmem>>, vector<8x1xf32>
    tpu.vector_store %arg8[%c0_20, %c0_21], %33 {strides = array<i32>} : memref<8x1xf32, #tpu.memory_space<vmem>>, vector<8x1xf32>,
    return
  }
  func.func @transform_0(%arg0: i32) -> (i32, i32, i32) {
    %c0_i32 = arith.constant 0 : i32
    %c0_i32_0 = arith.constant 0 : i32
    %c0_i32_1 = arith.constant 0 : i32
    return %arg0, %c0_i32, %c0_i32_0 : i32, i32, i32
  }
  func.func @transform_1(%arg0: i32) -> (i32, i32) {
    %c0_i32 = arith.constant 0 : i32
    %c0_i32_0 = arith.constant 0 : i32
    %c0_i32_1 = arith.constant 0 : i32
    return %c0_i32, %c0_i32_0 : i32, i32
  }
  func.func @transform_2(%arg0: i32) -> (i32, i32) {
    %c0_i32 = arith.constant 0 : i32
    %c0_i32_0 = arith.constant 0 : i32
    %c0_i32_1 = arith.constant 0 : i32
    return %c0_i32, %c0_i32_0 : i32, i32
  }
  func.func @transform_3(%arg0: i32) -> (i32, i32) {
    %c0_i32 = arith.constant 0 : i32
    %c0_i32_0 = arith.constant 0 : i32
    %c0_i32_1 = arith.constant 0 : i32
    return %c0_i32, %c0_i32_0 : i32, i32
  }
  func.func @transform_4(%arg0: i32) -> (i32, i32) {
    %c0_i32 = arith.constant 0 : i32
    %c0_i32_0 = arith.constant 0 : i32
    %c0_i32_1 = arith.constant 0 : i32
    return %c0_i32, %c0_i32_0 : i32, i32
  }
  func.func @transform_5(%arg0: i32) -> (i32, i32) {
    %c0_i32 = arith.constant 0 : i32
    %c0_i32_0 = arith.constant 0 : i32
    %c0_i32_1 = arith.constant 0 : i32
    return %c0_i32, %c0_i32_0 : i32, i32
  }
  func.func @transform_6(%arg0: i32) -> (i32, i32) {
    %c0_i32 = arith.constant 0 : i32
    %c0_i32_0 = arith.constant 0 : i32
    %c0_i32_1 = arith.constant 0 : i32
    return %c0_i32, %c0_i32_0 : i32, i32
  }
  func.func @transform_7(%arg0: i32) -> (i32, i32) {
    %c0_i32 = arith.constant 0 : i32
    %c0_i32_0 = arith.constant 0 : i32
    return %arg0, %c0_i32 : i32, i32
  }
}

</mosaic_0001>

<bundles_post_ra>
// kernel: tpu_custom_call.1
= control target key start
LH: loop header
LB: loop body
LE: loop exit
PB: predicated region body
PF: predicated region fallthrough
CT: control target
= control target key end

     0   :  { %vm76_vm0 = vcmask 1043456   ;;  %vm51_vm1 = vcmask 31744   ;;  %vm207_vm2 = vcmask 261120   ;;  %vm361_vm3 = vcmask 130048   ;;  %s672_s1 = inlined_call_operand.vmem [shape: f32[4,32], index: 1, kind: input, shape index: {}]   ;;  %s673_s0 = inlined_call_operand.vmem [shape: f32[8,8,4], index: 0, kind: input, shape index: {}]   ;;  %s674_s3 = inlined_call_operand.vmem [shape: f32[32,16], index: 3, kind: input, shape index: {}]   ;;  %s675_s2 = inlined_call_operand.vmem [shape: f32[1,32], index: 2, kind: input, shape index: {}]   ;;  %s676_s4 = inlined_call_operand.vmem [shape: f32[1,16], index: 4, kind: input, shape index: {}]   ;;  %s677_s5 = inlined_call_operand.vmem [shape: f32[8,16], index: 5, kind: input, shape index: {}]   ;;  %s678_s6 = inlined_call_operand.<no memory space> [shape: f32[1,1], index: 6, kind: input, shape index: {}]   ;;  %s679_s7 = inlined_call_operand.vmem [shape: f32[8,1], index: 7, kind: output, shape index: {}]  }
   0x1   :  { %v28_v0 = vld [vmem:[%s672_s1] sm:$0xf]  ;;  %v38_v2 = vld [vmem:[%s673_s0 + $0x8] sm:$0xff]  ;;  %v39_v3 = vld [vmem:[%s673_s0 + $0x10] sm:$0xff]  ;;  %vm428_vm4 = vcmask 1041409   ;;  %vm430_vm5 = vcmask 1042434  }
   0x2   :  { %v37_v1 = vld [vmem:[%s673_s0] sm:$0xff]  ;;  %508 = vmatprep.subr.msk.mxu0 %vm76_vm0, %v28_v0  ;;  %v40_v4 = vld [vmem:[%s673_s0 + $0x18] sm:$0xff]  ;;  %v42_v6 = vld [vmem:[%s673_s0 + $0x28] sm:$0xff]  ;;  %vm432_vm6 = vcmask 1043459   ;;  %vm434_vm7 = vcmask 1044484   ;;  %vm436_vm8 = vcmask 1045509  }
   0x3   :  { %510 = vmatprep.mubr.msk.f32.mxu0 %vm51_vm1, %v37_v1  ;;  %509 = vmatpush3.msk.msra.mxu0 %vm76_vm0, %v28_v0  ;;  %v41_v5 = vld [vmem:[%s673_s0 + $0x20] sm:$0xff]  ;;  %v43_v7 = vld [vmem:[%s673_s0 + $0x30] sm:$0xff]  ;;  %v44_v8 = vld [vmem:[%s673_s0 + $0x38] sm:$0xff]  ;;  %vm438_vm9 = vcmask 1046534   ;;  %vm440_vm10 = vcmask 1047559   ;;  %vm443_vm11 = vcmask 64512  }
   0x4   :  { %511 = vmatmul.mubr.msk.f32.vlgmr.msra.gmra.mrb[0].mxu0 %vm51_vm1, %v38_v2  ;;  %v29_v9 = vld [vmem:[%s674_s3] sm:$0xff]  ;;  %v30_v10 = vld [vmem:[%s674_s3 + $0x8] sm:$0xff]  ;;  %v31_v12 = vld [vmem:[%s674_s3 + $0x10] sm:$0xff]  ;;  %vm460_vm12 = vcmask 7168  }
   0x5   :  { %513 = vmatprep.mubr.msk.f32.mxu0 %vm51_vm1, %v39_v3  ;;  %v542_v11 = vpack.c.bf16 %v30_v10, %v29_v9  ;;  %v32_v13 = vld [vmem:[%s674_s3 + $0x18] sm:$0xff]  ;;  %v466_v15 = vld [vmem:[%s675_s2] ss:$0 sm:$0xff] }
   0x6   :  { %v546_v14 = vpack.c.bf16 %v32_v13, %v31_v12  ;;  %v476_v48 = vld [vmem:[%s676_s4] ss:$0 sm:$0xff] }
   0x7   :  { %543 = vmatprep.subr.bf16.mxu1 %v542_v11  ;;  %v35_v56 = vld [vmem:[%s677_s5] sm:$0xff] }
   0x8   :  { %514 = vmatmul.mubr.msk.f32.gmra.mrb[2].mxu0 %vm51_vm1, %v40_v4  ;;  %545 = vmatpush3.bf16.msra.mxu1 %v542_v11 }
   0x9   :  { %516 = vmatprep.mubr.msk.f32.mxu0 %vm51_vm1, %v41_v5  ;;  %547 = vmatprep.subr.bf16.mxu1 %v546_v14 }
   0xc   :  { %517 = vmatmul.mubr.msk.f32.gmra.mrb[4].mxu0 %vm51_vm1, %v42_v6  ;;  %549 = vmatpush3.bf16.msra.mxu1 %v546_v14 }
   0xd   :  { %519 = vmatprep.mubr.msk.f32.mxu0 %vm51_vm1, %v43_v7 }
  0x10   :  { %520 = vmatmul.mubr.msk.f32.gmra.mrb[6].mxu0 %vm51_vm1, %v44_v8 }
  0xd7   :  { %v512_v16 = vpop.f32.mrb[0].mxu0 }
  0xd8   :  { %v152_v17 = vadd.f32 %v512_v16, %v466_v15  ;;  %v146_v18 = vpop.f32.mrb[1].mxu0 }
  0xd9   :  { %v147_v19 = vadd.f32 %v466_v15, %v146_v18 }
  0xda   :  { %v186_v20 = vmul.f32 0.01, %v152_v17 }
  0xdb   :  { %v185_v21 = vmul.f32 0.01, %v147_v19  ;;  %v515_v22 = vpop.f32.mrb[2].mxu0 }
  0xdc   :  { %v162_v23 = vadd.f32 %v515_v22, %v466_v15  ;;  %v156_v24 = vpop.f32.mrb[3].mxu0  ;;  %v194_v27 = vmax.f32 %v152_v17, %v186_v20 }
  0xdd   :  { %v157_v25 = vadd.f32 %v466_v15, %v156_v24  ;;  %v193_v26 = vmax.f32 %v147_v19, %v185_v21 }
  0xde   :  { %v188_v28 = vmul.f32 0.01, %v162_v23 }
  0xdf   :  { %v187_v29 = vmul.f32 0.01, %v157_v25  ;;  %v518_v30 = vpop.f32.mrb[4].mxu0  ;;  %530 = vmatprep.mubr.msk.f32.mxu1 %vm207_vm2, %v193_v26 }
  0xe0   :  { %v172_v31 = vadd.f32 %v518_v30, %v466_v15  ;;  %v166_v32 = vpop.f32.mrb[5].mxu0  ;;  %531 = vmatmul.mubr.msk.f32.vlgmr.msra.gmra.mrb[0].mxu1 %vm207_vm2, %v194_v27  ;;  %v196_v35 = vmax.f32 %v162_v23, %v188_v28 }
  0xe1   :  { %v195_v33 = vmax.f32 %v157_v25, %v187_v29  ;;  %v167_v34 = vadd.f32 %v466_v15, %v166_v32 }
  0xe2   :  { %v190_v36 = vmul.f32 0.01, %v172_v31 }
  0xe3   :  { %v189_v37 = vmul.f32 0.01, %v167_v34  ;;  %v521_v38 = vpop.f32.mrb[6].mxu0  ;;  %533 = vmatprep.mubr.msk.f32.mxu1 %vm207_vm2, %v195_v33 }
  0xe4   :  { %v182_v39 = vadd.f32 %v521_v38, %v466_v15  ;;  %v176_v40 = vpop.f32.mrb[7].mxu0  ;;  %534 = vmatmul.mubr.msk.f32.gmra.mrb[2].mxu1 %vm207_vm2, %v196_v35  ;;  %v198_v43 = vmax.f32 %v172_v31, %v190_v36  ;;  %v394_v35 = vlaneseq }
  0xe5   :  { %v197_v41 = vmax.f32 %v167_v34, %v189_v37  ;;  %v177_v42 = vadd.f32 %v466_v15, %v176_v40  ;;  %v12_v34 = vstv %s678_s6 }
  0xe6   :  { %v192_v44 = vmul.f32 0.01, %v182_v39  ;;  %13 = vst [vmem:[#allocation2] sm:$0x1] %v12_v34  ;;  %v395_v36 = vand.u32 127, %v394_v35  ;;  %v397_v37 = vshrl.u32 %v394_v35, 7 }
  0xe7   :  { %v191_v45 = vmul.f32 0.01, %v177_v42  ;;  %536 = vmatprep.mubr.msk.f32.mxu1 %vm207_vm2, %v197_v41 }
  0xe8   :  { %537 = vmatmul.mubr.msk.f32.gmra.mrb[4].mxu1 %vm207_vm2, %v198_v43  ;;  %v200_v47 = vmax.f32 %v182_v39, %v192_v44  ;;  %v398_v39 = vsub.s32 %v395_v36, %v397_v37 }
  0xe9   :  { %v199_v46 = vmax.f32 %v177_v42, %v191_v45 }
  0xeb   :  { %539 = vmatprep.mubr.msk.f32.mxu1 %vm207_vm2, %v199_v46 }
  0xec   :  { %540 = vmatmul.mubr.msk.f32.gmra.mrb[6].mxu1 %vm207_vm2, %v200_v47 }
 0x1b3   :  { %v532_v49 = vpop.f32.mrb[0].mxu1 }
 0x1b4   :  { %v304_v50 = vadd.f32 %v532_v49, %v476_v48  ;;  %v298_v51 = vpop.f32.mrb[1].mxu1 }
 0x1b5   :  { %v299_v52 = vadd.f32 %v476_v48, %v298_v51 }
 0x1b6   :  { %v338_v53 = vmul.f32 0.01, %v304_v50 }
 0x1b7   :  { %v337_v54 = vmul.f32 0.01, %v299_v52  ;;  %v535_v55 = vpop.f32.mrb[2].mxu1 }
 0x1b8   :  { %v346_v57 = vmax.f32 %v304_v50, %v338_v53  ;;  %v314_v58 = vadd.f32 %v535_v55, %v476_v48  ;;  %v308_v59 = vpop.f32.mrb[3].mxu1 }
 0x1b9   :  { %v345_v60 = vmax.f32 %v299_v52, %v337_v54  ;;  %v309_v61 = vadd.f32 %v476_v48, %v308_v59 }
 0x1ba   :  { %v340_v62 = vmul.f32 0.01, %v314_v58  ;;  %v354_v63 = vmul.f32 %v346_v57, %v35_v56 }
 0x1bb   :  { %v339_v0 = vmul.f32 0.01, %v309_v61  ;;  %v538_v1 = vpop.f32.mrb[4].mxu1  ;;  %v353_v2 = vmul.f32 %v345_v60, %v35_v56 }
 0x1bc   :  { %v348_v3 = vmax.f32 %v314_v58, %v340_v62  ;;  %v324_v4 = vadd.f32 %v538_v1, %v476_v48  ;;  %v318_v5 = vpop.f32.mrb[5].mxu1  ;;  %v365_v6 = vsel %vm361_vm3, %v354_v63, 0.0  ;;  %v485_v63 = vld [vmem:[#allocation2] ss:$0 sm:$0xff] }
 0x1bd   :  { %v347_v7 = vmax.f32 %v309_v61, %v339_v0  ;;  %v319_v8 = vadd.f32 %v476_v48, %v318_v5  ;;  %366 = vadd.xlane.f32.xlu0 %v365_v6  ;;  %v362_v13 = vsel %vm361_vm3, %v353_v2, 0.0 }
 0x1be   :  { %v342_v9 = vmul.f32 0.01, %v324_v4  ;;  %v356_v10 = vmul.f32 %v348_v3, %v35_v56 }
 0x1bf   :  { %v341_v11 = vmul.f32 0.01, %v319_v8  ;;  %v541_v12 = vpop.f32.mrb[6].mxu1  ;;  %v355_v18 = vmul.f32 %v347_v7, %v35_v56 }
 0x1c0   :  { %v350_v14 = vmax.f32 %v324_v4, %v342_v9  ;;  %v334_v15 = vadd.f32 %v541_v12, %v476_v48  ;;  %v328_v16 = vpop.f32.mrb[7].mxu1  ;;  %v371_v17 = vsel %vm361_vm3, %v356_v10, 0.0 }
 0x1c1   :  { %v349_v19 = vmax.f32 %v319_v8, %v341_v11  ;;  %v329_v20 = vadd.f32 %v476_v48, %v328_v16  ;;  %372 = vadd.xlane.f32.xlu1 %v371_v17  ;;  %363 = vadd.xlane.f32.xlu0 %v362_v13  ;;  %v368_v25 = vsel %vm361_vm3, %v355_v18, 0.0 }
 0x1c2   :  { %v344_v21 = vmul.f32 0.01, %v334_v15  ;;  %v358_v26 = vmul.f32 %v350_v14, %v35_v56 }
 0x1c3   :  { %v343_v22 = vmul.f32 0.01, %v329_v20  ;;  %v357_v23 = vmul.f32 %v349_v19, %v35_v56 }
 0x1c4   :  { %v352_v24 = vmax.f32 %v334_v15, %v344_v21  ;;  %v377_v30 = vsel %vm361_vm3, %v358_v26, 0.0 }
 0x1c5   :  { %v351_v27 = vmax.f32 %v329_v20, %v343_v22  ;;  %369 = vadd.xlane.f32.xlu1 %v368_v25  ;;  %v374_v28 = vsel %vm361_vm3, %v357_v23, 0.0 }
 0x1c6   :  { %375 = vadd.xlane.f32.xlu0 %v374_v28  ;;  %v360_v31 = vmul.f32 %v352_v24, %v35_v56 }
 0x1c7   :  { %v359_v29 = vmul.f32 %v351_v27, %v35_v56 }
 0x1c8   :  { %v383_v33 = vsel %vm361_vm3, %v360_v31, 0.0 }
 0x1c9   :  { %378 = vadd.xlane.f32.xlu1 %v377_v30  ;;  %v380_v32 = vsel %vm361_vm3, %v359_v29, 0.0 }
 0x1ca   :  { %381 = vadd.xlane.f32.xlu0 %v380_v32 }
 0x1cd   :  { %384 = vadd.xlane.f32.xlu1 %v383_v33 }
 0x24a   :  { %v367_v38 = vpop.xlane.xlu0 %366 }
 0x24b   :  { %v403_v43 = vrot.slane %v367_v38, %v398_v39 }
 0x24e   :  { %v373_v40 = vpop.xlane.xlu1 %372  ;;  %v364_v41 = vpop.xlane.xlu0 %363 }
 0x24f   :  { %v399_v42 = vrot.slane %v364_v41, %v398_v39  ;;  %v411_v47 = vrot.slane %v373_v40, %v398_v39 }
 0x251   :  { %v429_v48 = vsel %vm428_vm4, %v403_v43, %v399_v42 }
 0x252   :  { %v370_v44 = vpop.xlane.xlu1 %369 }
 0x253   :  { %v407_v45 = vrot.slane %v370_v44, %v398_v39  ;;  %v376_v46 = vpop.xlane.xlu0 %375 }
 0x254   :  { %v415_v49 = vrot.slane %v376_v46, %v398_v39 }
 0x255   :  { %v431_v50 = vsel %vm430_vm5, %v407_v45, %v429_v48 }
 0x256   :  { %v433_v51 = vsel %vm432_vm6, %v411_v47, %v431_v50  ;;  %v379_v52 = vpop.xlane.xlu1 %378 }
 0x257   :  { %v435_v53 = vsel %vm434_vm7, %v415_v49, %v433_v51  ;;  %v419_v54 = vrot.slane %v379_v52, %v398_v39  ;;  %v382_v55 = vpop.xlane.xlu0 %381 }
 0x258   :  { %v423_v56 = vrot.slane %v382_v55, %v398_v39 }
 0x259   :  { %v437_v57 = vsel %vm436_vm8, %v419_v54, %v435_v53 }
 0x25a   :  { %v385_v58 = vpop.xlane.xlu1 %384  ;;  %v439_v60 = vsel %vm438_vm9, %v423_v56, %v437_v57 }
 0x25b   :  { %v427_v59 = vrot.slane %v385_v58, %v398_v39 }
 0x25d   :  { %v441_v61 = vsel %vm440_vm10, %v427_v59, %v439_v60 }
 0x25e   :  { %v444_v62 = vsel %vm443_vm11, %v441_v61, 0.0 }
 0x25f   :  { %445 = vadd.xlane.f32.xlu0 %v444_v62 }
 0x2ec   :  { %v446_v0 = vpop.xlane.xlu0 %445 }
 0x2ed   :  { %v453_v1 = vadd.f32 %v485_v63, %v446_v0 }
 0x2ef   :  { %v486_v2 = vmul.f32 -1.442695, %v453_v1 }
 0x2f1   :  { %550 = vpow2.f32 %v486_v2 }
 0x2fb   :  { %v551_v3 = vpop.eup %550 }
 0x2fc   :  { %v457_v4 = vadd.f32 1.0, %v551_v3 }
 0x2fe   :  { %552 = vrcp.f32 %v457_v4 }
 0x308   :  { %v553_v5 = vpop.eup %552 }
 0x309   :  { %461 = vst.msk [vmem:[%s679_s7] sm:$0xff] %vm460_vm12, %v553_v5 }

</bundles_post_ra>
